<compile_context>
chip_gen: v5e
topology: v5e:2x2
jax: 0.10.0
libtpu: 0.0.40
codegen_flags: <defaults>
</compile_context>

<pallas_src>
import functools
import math

import jax
import jax.numpy as jnp
from jax.experimental import pallas as pl
from jax.experimental.pallas import tpu as pltpu

DROPOUT_P = 0.2


def _round_up(v, m):
    return (v + m - 1) // m * m


def _ffn_kernel(x_ref, w1_ref, b1_ref, w2_ref, b2_ref, *rest,
                apply_dropout: bool):
    """One (row-tile, hidden-tile) step of the fused FFN."""
    if apply_dropout:
        mask_ref, o_ref, acc_ref = rest
    else:
        o_ref, acc_ref = rest

    h_idx = pl.program_id(1)

    @pl.when(h_idx == 0)
    def _init():
        acc_ref[...] = jnp.zeros_like(acc_ref)

    # First linear + ReLU: native-dtype operands on the MXU, f32 accumulation.
    h = jnp.dot(x_ref[...], w1_ref[...], preferred_element_type=jnp.float32)
    h = jnp.maximum(h + b1_ref[...].astype(jnp.float32), 0.0)

    # Second linear: accumulate the partial product for this hidden tile.
    acc_ref[...] += jnp.dot(h.astype(w2_ref.dtype), w2_ref[...],
                            preferred_element_type=jnp.float32)

    @pl.when(h_idx == pl.num_programs(1) - 1)
    def _finalize():
        y = acc_ref[...] + b2_ref[...].astype(jnp.float32)
        if apply_dropout:
            # mask already contains the inverted-dropout scale 1/(1-p).
            y = y * mask_ref[...].astype(jnp.float32)
        o_ref[...] = y.astype(o_ref.dtype)


def feed_forward(x, params, *, training: bool = False, seed: int = 0):
    """Apply the FeedForward block to x of shape (B, T, n_embd)."""
    w1, b1, w2, b2 = params
    B, T, C = x.shape
    H = w1.shape[1]                        # 4 * n_embd
    M = B * T

    # ---- tile sizes ------------------------------------------------------
    bm = 256 if M >= 256 else _round_up(M, 8)          # MXU-friendly row tile
    th = 512 if (H > 512 and H % 512 == 0) else H      # hidden reduction tile

    # ---- pad to tile / lane boundaries ------------------------------------
    M_pad = _round_up(M, bm)
    C_out = _round_up(C, 128)              # lane-dense output stores

    x2 = x.reshape(M, C)
    if M_pad != M:
        x2 = jnp.pad(x2, ((0, M_pad - M), (0, 0)))
    if C_out != C:
        w2 = jnp.pad(w2, ((0, 0), (0, C_out - C)))
        b2 = jnp.pad(b2, ((0, 0), (0, C_out - C)))

    n_m = M_pad // bm
    n_h = H // th

    inputs = [x2, w1, b1, w2, b2]
    in_specs = [
        pl.BlockSpec((bm, C), lambda i, h: (i, 0)),       # x row tile
        pl.BlockSpec((C, th), lambda i, h: (0, h)),        # W1 hidden tile
        pl.BlockSpec((1, th), lambda i, h: (0, h)),        # b1 hidden tile
        pl.BlockSpec((th, C_out), lambda i, h: (h, 0)),    # W2 hidden tile
        pl.BlockSpec((1, C_out), lambda i, h: (0, 0)),     # b2
    ]

    if training:
        keep = 1.0 - DROPOUT_P
        key = jax.random.PRNGKey(seed)
        mask = jax.random.bernoulli(key, keep, (M_pad, C_out))
        mask = mask.astype(x.dtype) / jnp.asarray(keep, x.dtype)
        inputs.append(mask)
        in_specs.append(pl.BlockSpec((bm, C_out), lambda i, h: (i, 0)))

    itemsize = jnp.dtype(x.dtype).itemsize
    cost = pl.CostEstimate(
        flops=4 * M * C * H,
        transcendentals=0,
        bytes_accessed=(M * C + C * H + H + H * C + C + 2 * M * C) * itemsize,
    )

    out = pl.pallas_call(
        functools.partial(_ffn_kernel, apply_dropout=training),
        out_shape=jax.ShapeDtypeStruct((M_pad, C_out), x.dtype),
        grid=(n_m, n_h),
        in_specs=in_specs,
        out_specs=pl.BlockSpec((bm, C_out), lambda i, h: (i, 0)),
        scratch_shapes=[pltpu.VMEM((bm, C_out), jnp.float32)],
        compiler_params=pltpu.CompilerParams(
            dimension_semantics=("parallel", "arbitrary")),
        cost_estimate=cost,
    )(*inputs)

    return out[:M, :C].reshape(B, T, C)


def init_feed_forward_params(key, n_embd, dtype=jnp.float32):
    """Init matching nn.Linear's default U(-1/sqrt(fan_in), 1/sqrt(fan_in))."""
    hidden = 4 * n_embd
    k1, k2, k3, k4 = jax.random.split(key, 4)
    bound1 = 1.0 / math.sqrt(n_embd)
    bound2 = 1.0 / math.sqrt(hidden)
    # Stored as (in, out) — i.e. the transpose of PyTorch's (out, in) weight.
    w1 = jax.random.uniform(k1, (n_embd, hidden), dtype, -bound1, bound1)
    b1 = jax.random.uniform(k2, (1, hidden), dtype, -bound1, bound1)
    w2 = jax.random.uniform(k3, (hidden, n_embd), dtype, -bound2, bound2)
    b2 = jax.random.uniform(k4, (1, n_embd), dtype, -bound2, bound2)
    return (w1, b1, w2, b2)


def _reference(x, params):
    w1, b1, w2, b2 = params
    h = jnp.maximum(x @ w1 + b1, 0.0)
    return h @ w2 + b2          # eval-mode dropout == identity


if __name__ == "__main__":
    n_embd = 32
    B, T = 2, 8

    root = jax.random.PRNGKey(0)
    kx, kp = jax.random.split(root)
    x = jax.random.normal(kx, (B, T, n_embd), dtype=jnp.float32)
    params = init_feed_forward_params(kp, n_embd)

    # Eval-mode forward (dropout is identity, matching module.eval()).
    y = jax.block_until_ready(feed_forward(x, params, training=False))
    y_ref = _reference(x, params)
    assert y.shape == (B, T, n_embd)
    assert jnp.allclose(y, y_ref, atol=1e-5, rtol=1e-5)

    # Training mode (inverted dropout applied inside the kernel's finalize step).
    y_train = jax.block_until_ready(feed_forward(x, params, training=True, seed=123))
    assert y_train.shape == (B, T, n_embd)
    assert bool(jnp.all(jnp.isfinite(y_train)))

    print("KERNEL_OK")
</pallas_src>

<mosaic_0001>
module attributes {stable_mosaic.version = 11 : i64} {
  func.func @_ffn_kernel(%arg0: i32, %arg1: i32, %arg2: memref<16x32xf32, #tpu.memory_space<vmem>>, %arg3: memref<32x128xf32, #tpu.memory_space<vmem>>, %arg4: memref<1x128xf32, #tpu.memory_space<vmem>>, %arg5: memref<128x128xf32, #tpu.memory_space<vmem>>, %arg6: memref<1x128xf32, #tpu.memory_space<vmem>>, %arg7: memref<16x128xf32, #tpu.memory_space<vmem>>, %arg8: memref<16x128xf32, #tpu.memory_space<vmem>>) attributes {dimension_semantics = [#tpu.dimension_semantics<parallel>, #tpu.dimension_semantics<arbitrary>], iteration_bounds = array<i64: 1, 1>, scalar_prefetch = 0 : i64, scratch_operands = 1 : i64, tpu.core_type = #tpu.core_type<tc>, window_params = [{transform_indices = @transform_0, window_bounds = array<i64: 16, 32>}, {transform_indices = @transform_1, window_bounds = array<i64: 32, 128>}, {transform_indices = @transform_2, window_bounds = array<i64: 1, 128>}, {transform_indices = @transform_3, window_bounds = array<i64: 128, 128>}, {pipeline_mode = #tpu.pipeline_mode<synchronous>, transform_indices = @transform_4, window_bounds = array<i64: 1, 128>}, {transform_indices = @transform_5, window_bounds = array<i64: 16, 128>}]} {
    %c0_i32 = arith.constant 0 : i32
    %0 = arith.cmpi eq, %arg1, %c0_i32 : i32
    %1 = arith.extui %0 : i1 to i32
    %c0_i32_0 = arith.constant 0 : i32
    %2 = arith.cmpi ne, %1, %c0_i32_0 : i32
    scf.if %2 {
      %cst_16 = arith.constant 0.000000e+00 : f32
      %19 = vector.broadcast %cst_16 : f32 to vector<16x128xf32>
      %c0_17 = arith.constant 0 : index
      %c0_18 = arith.constant 0 : index
      %20 = vector.load %arg8[%c0_17, %c0_18] : memref<16x128xf32, #tpu.memory_space<vmem>>, vector<16x128xf32>
      tpu.vector_store %arg8[%c0_17, %c0_18], %19 {strides = array<i32>} : memref<16x128xf32, #tpu.memory_space<vmem>>, vector<16x128xf32>,
    } else {
    }
    %c0 = arith.constant 0 : index
    %c0_1 = arith.constant 0 : index
    %3 = vector.load %arg2[%c0, %c0_1] : memref<16x32xf32, #tpu.memory_space<vmem>>, vector<16x32xf32>
    %c0_2 = arith.constant 0 : index
    %c0_3 = arith.constant 0 : index
    %4 = vector.load %arg3[%c0_2, %c0_3] : memref<32x128xf32, #tpu.memory_space<vmem>>, vector<32x128xf32>
    %cst = arith.constant dense<0.000000e+00> : vector<16x128xf32>
    %5 = tpu.matmul %3, %4, %cst {dimension_numbers = #tpu.dot_dimension_numbers<[1], [0], [0], [1], [0, 0, 1, 1], [], []>} : vector<16x32xf32>, vector<32x128xf32>, vector<16x128xf32> -> vector<16x128xf32>
    %c0_4 = arith.constant 0 : index
    %c0_5 = arith.constant 0 : index
    %6 = vector.load %arg4[%c0_4, %c0_5] : memref<1x128xf32, #tpu.memory_space<vmem>>, vector<1x128xf32>
    %7 = vector.broadcast %6 : vector<1x128xf32> to vector<16x128xf32>
    %8 = arith.addf %5, %7 : vector<16x128xf32>
    %cst_6 = arith.constant 0.000000e+00 : f32
    %9 = vector.broadcast %cst_6 : f32 to vector<16x128xf32>
    %10 = arith.maximumf %8, %9 : vector<16x128xf32>
    %c0_7 = arith.constant 0 : index
    %c0_8 = arith.constant 0 : index
    %11 = vector.load %arg8[%c0_7, %c0_8] : memref<16x128xf32, #tpu.memory_space<vmem>>, vector<16x128xf32>
    %c0_9 = arith.constant 0 : index
    %c0_10 = arith.constant 0 : index
    %12 = vector.load %arg5[%c0_9, %c0_10] : memref<128x128xf32, #tpu.memory_space<vmem>>, vector<128x128xf32>
    %cst_11 = arith.constant dense<0.000000e+00> : vector<16x128xf32>
    %13 = tpu.matmul %10, %12, %cst_11 {dimension_numbers = #tpu.dot_dimension_numbers<[1], [0], [0], [1], [0, 0, 1, 1], [], []>} : vector<16x128xf32>, vector<128x128xf32>, vector<16x128xf32> -> vector<16x128xf32>
    %14 = arith.addf %11, %13 : vector<16x128xf32>
    %c0_12 = arith.constant 0 : index
    %c0_13 = arith.constant 0 : index
    %15 = vector.load %arg8[%c0_12, %c0_13] : memref<16x128xf32, #tpu.memory_space<vmem>>, vector<16x128xf32>
    tpu.vector_store %arg8[%c0_12, %c0_13], %14 {strides = array<i32>} : memref<16x128xf32, #tpu.memory_space<vmem>>, vector<16x128xf32>,
    %c0_i32_14 = arith.constant 0 : i32
    %16 = arith.cmpi eq, %arg1, %c0_i32_14 : i32
    %17 = arith.extui %16 : i1 to i32
    %c0_i32_15 = arith.constant 0 : i32
    %18 = arith.cmpi ne, %17, %c0_i32_15 : i32
    scf.if %18 {
      %c0_16 = arith.constant 0 : index
      %c0_17 = arith.constant 0 : index
      %19 = vector.load %arg8[%c0_16, %c0_17] : memref<16x128xf32, #tpu.memory_space<vmem>>, vector<16x128xf32>
      %c0_18 = arith.constant 0 : index
      %c0_19 = arith.constant 0 : index
      %20 = vector.load %arg6[%c0_18, %c0_19] : memref<1x128xf32, #tpu.memory_space<vmem>>, vector<1x128xf32>
      %21 = vector.broadcast %20 : vector<1x128xf32> to vector<16x128xf32>
      %22 = arith.addf %19, %21 : vector<16x128xf32>
      %c0_20 = arith.constant 0 : index
      %c0_21 = arith.constant 0 : index
      %23 = vector.load %arg7[%c0_20, %c0_21] : memref<16x128xf32, #tpu.memory_space<vmem>>, vector<16x128xf32>
      tpu.vector_store %arg7[%c0_20, %c0_21], %22 {strides = array<i32>} : memref<16x128xf32, #tpu.memory_space<vmem>>, vector<16x128xf32>,
    } else {
    }
    return
  }
  func.func @transform_0(%arg0: i32, %arg1: i32) -> (i32, i32) {
    %c0_i32 = arith.constant 0 : i32
    %c0_i32_0 = arith.constant 0 : i32
    return %arg0, %c0_i32 : i32, i32
  }
  func.func @transform_1(%arg0: i32, %arg1: i32) -> (i32, i32) {
    %c0_i32 = arith.constant 0 : i32
    %c0_i32_0 = arith.constant 0 : i32
    return %c0_i32, %arg1 : i32, i32
  }
  func.func @transform_2(%arg0: i32, %arg1: i32) -> (i32, i32) {
    %c0_i32 = arith.constant 0 : i32
    %c0_i32_0 = arith.constant 0 : i32
    return %c0_i32, %arg1 : i32, i32
  }
  func.func @transform_3(%arg0: i32, %arg1: i32) -> (i32, i32) {
    %c0_i32 = arith.constant 0 : i32
    %c0_i32_0 = arith.constant 0 : i32
    return %arg1, %c0_i32 : i32, i32
  }
  func.func @transform_4(%arg0: i32, %arg1: i32) -> (i32, i32) {
    %c0_i32 = arith.constant 0 : i32
    %c0_i32_0 = arith.constant 0 : i32
    %c0_i32_1 = arith.constant 0 : i32
    return %c0_i32, %c0_i32_0 : i32, i32
  }
  func.func @transform_5(%arg0: i32, %arg1: i32) -> (i32, i32) {
    %c0_i32 = arith.constant 0 : i32
    %c0_i32_0 = arith.constant 0 : i32
    return %arg0, %c0_i32 : i32, i32
  }
}

</mosaic_0001>

<bundles_post_ra>
// kernel: tpu_custom_call.1
= control target key start
LH: loop header
LB: loop body
LE: loop exit
PB: predicated region body
PF: predicated region fallthrough
CT: control target
= control target key end

     0   :  { %10 = vsyncpa [#allocation4], 0  ;;  %s390_s0 = inlined_call_operand.hbm [shape: f32[16,32], index: 0, kind: input, shape index: {}]   ;;  %s391_s1 = inlined_call_operand.hbm [shape: f32[32,128], index: 1, kind: input, shape index: {}]   ;;  %s392_s2 = inlined_call_operand.vmem [shape: f32[1,128], index: 2, kind: input, shape index: {}]   ;;  %s393_s3 = inlined_call_operand.hbm [shape: f32[128,128], index: 3, kind: input, shape index: {}]   ;;  %s394_s4 = inlined_call_operand.vmem [shape: f32[1,128], index: 4, kind: input, shape index: {}]   ;;  %s395_s5 = inlined_call_operand.hbm [shape: f32[16,128], index: 5, kind: output, shape index: {}]  }
   0x1   :  { %11 = vsyncpa [#allocation7], 0 }
   0x2   :  { %12 = vsyncpa [#allocation5], 0  ;;  %s30_s20 = sshll.u32 %s391_s1, 4  ;;  %s322_s21 = smov [#allocation6]   ;;  %s31_s20 = int_to_ptr.hbm [resolvable:$true] %s30_s20 }
   0x3   :  { %s32_s22 = sshll.u32 %s322_s21, 4  ;;  %s17_s25 = sshll.u32 %s390_s0, 4  ;;  %s33_s22 = int_to_ptr.vmem [resolvable:$true] %s32_s22  ;;  %s18_s25 = int_to_ptr.hbm [resolvable:$true] %s17_s25 }
   0x4   :  { %s323_s26 = smov 128   ;;  %s324_s27 = smov 8  }
   0x5   :  { %38 = dma.hbm_to_vmem [thread:$0]  %s31_s20, 512, %s33_s22, [#allocation7], %s323_s26, %s323_s26, %s324_s27  }
   0x6   :  { %s325_s28 = smov [#allocation3]   ;;  %s45_s1 = sshll.u32 %s393_s3, 4  ;;  %s46_s1 = int_to_ptr.hbm [resolvable:$true] %s45_s1 }
   0x7   :  { %s19_s29 = sshll.u32 %s325_s28, 4  ;;  %s326_s0 = smov [#allocation8]   ;;  %s20_s29 = int_to_ptr.vmem [resolvable:$true] %s19_s29 }
   0x8   :  { %25 = dma.hbm_to_vmem [thread:$0]  %s18_s25, 256, %s20_s29, [#allocation4], %s323_s26, %s323_s26, %s324_s27  }
   0x9   :  { %s47_s7 = sshll.u32 %s326_s0, 4  ;;  %s48_s7 = int_to_ptr.vmem [resolvable:$true] %s47_s7 }
   0xa   :  { %53 = dma.hbm_to_vmem [thread:$0]  %s46_s1, 2048, %s48_s7, [#allocation7], %s323_s26, %s323_s26, %s324_s27  }
   0xb   :  { %316 = dma.done.wait [#allocation4], 256  }
   0xc   :  { %317 = vsyncadd [#allocation4], 4294967040 }
   0xd   :  { %318 = dma.done.wait [#allocation7], 2560  }
   0xe   :  { %319 = vsyncadd [#allocation7], 4294964736  ;;  %v79_v0 = vld [vmem:[#allocation6 + $0x18] sm:$0xff]  ;;  %v78_v1 = vld [vmem:[#allocation6 + $0x10] sm:$0xff]  ;;  %vm84_vm0 = vcmask 261120   ;;  %s327_s11 = smov [#allocation9]  }
   0xf   :  { %103 = vmatpush.msra.mxu0 %v79_v0  ;;  %v77_v2 = vld [vmem:[#allocation6 + $0x8] sm:$0xff]  ;;  %v133_v3 = vld [vmem:[#allocation8 + $0x78] sm:$0xff]  ;;  %v132_v4 = vld [vmem:[#allocation8 + $0x70] sm:$0xff]  ;;  %s178_s12 = sshll.u32 %s327_s11, 4  ;;  %s179_s12 = int_to_ptr.vmem [resolvable:$true] %s178_s12 }
  0x10   :  { %134 = vmatpush.msra.mxu1 %v133_v3  ;;  %v76_v5 = vld [vmem:[#allocation6] sm:$0xff]  ;;  %v131_v6 = vld [vmem:[#allocation8 + $0x68] sm:$0xff]  ;;  %196 = vmatpush.msra.mxu2 %v133_v3  ;;  %v74_v7 = vld [vmem:[#allocation3] sm:$0xff] }
  0x11   :  { %104 = vmatpush.msra.mxu0 %v78_v1  ;;  %v130_v8 = vld [vmem:[#allocation8 + $0x60] sm:$0xff]  ;;  %v129_v9 = vld [vmem:[#allocation8 + $0x58] sm:$0xff]  ;;  %v128_v10 = vld [vmem:[#allocation8 + $0x50] sm:$0xff] }
  0x12   :  { %135 = vmatpush.msra.mxu1 %v132_v4  ;;  %197 = vmatpush.msra.mxu2 %v132_v4  ;;  %v127_v11 = vld [vmem:[#allocation8 + $0x48] sm:$0xff]  ;;  %v75_v12 = vld [vmem:[#allocation3 + $0x8] sm:$0xff]  ;;  %v126_v13 = vld [vmem:[#allocation8 + $0x40] sm:$0xff] }
  0x13   :  { %105 = vmatpush.msra.mxu0 %v77_v2  ;;  %v125_v14 = vld [vmem:[#allocation8 + $0x38] sm:$0xff]  ;;  %v124_v15 = vld [vmem:[#allocation8 + $0x30] sm:$0xff]  ;;  %v123_v16 = vld [vmem:[#allocation8 + $0x28] sm:$0xff] }
  0x14   :  { %136 = vmatpush.msra.mxu1 %v131_v6  ;;  %198 = vmatpush.msra.mxu2 %v131_v6  ;;  %v122_v17 = vld [vmem:[#allocation8 + $0x20] sm:$0xff]  ;;  %v121_v18 = vld [vmem:[#allocation8 + $0x18] sm:$0xff]  ;;  %v120_v19 = vld [vmem:[#allocation8 + $0x10] sm:$0xff] }
  0x15   :  { %106 = vmatpush.msra.mxu0 %v76_v5  ;;  %v119_v20 = vld [vmem:[#allocation8 + $0x8] sm:$0xff]  ;;  %v118_v21 = vld [vmem:[#allocation8] sm:$0xff]  ;;  %v218_v22 = vld [vmem:[%s392_s2] ss:$0 sm:$0xff]  ;;  %s180_s2 = sshll.u32 %s395_s5, 4  ;;  %s181_s2 = int_to_ptr.hbm [resolvable:$true] %s180_s2 }
  0x16   :  { %194 = vmatmul.msk.f32.vlgmr.msra.gmra.mxu0 %vm84_vm0, %v74_v7  ;;  %137 = vmatpush.msra.mxu1 %v130_v8  ;;  %v219_v29 = vld [vmem:[%s394_s4] ss:$0 sm:$0xff] }
  0x17   :  { %199 = vmatpush.msra.mxu2 %v130_v8 }
  0x18   :  { %138 = vmatpush.msra.mxu1 %v129_v9 }
  0x19   :  { %200 = vmatpush.msra.mxu2 %v129_v9 }
  0x1a   :  { %139 = vmatpush.msra.mxu1 %v128_v10 }
  0x1b   :  { %201 = vmatpush.msra.mxu2 %v128_v10 }
  0x1c   :  { %140 = vmatpush.msra.mxu1 %v127_v11 }
  0x1d   :  { %202 = vmatpush.msra.mxu2 %v127_v11 }
  0x1e   :  { %195 = vmatmul.msk.f32.gmra.mxu0 %vm84_vm0, %v75_v12  ;;  %141 = vmatpush.msra.mxu1 %v126_v13 }
  0x1f   :  { %203 = vmatpush.msra.mxu2 %v126_v13 }
  0x20   :  { %142 = vmatpush.msra.mxu1 %v125_v14 }
  0x21   :  { %204 = vmatpush.msra.mxu2 %v125_v14 }
  0x22   :  { %143 = vmatpush.msra.mxu1 %v124_v15 }
  0x23   :  { %205 = vmatpush.msra.mxu2 %v124_v15 }
  0x24   :  { %144 = vmatpush.msra.mxu1 %v123_v16 }
  0x25   :  { %206 = vmatpush.msra.mxu2 %v123_v16 }
  0x26   :  { %145 = vmatpush.msra.mxu1 %v122_v17 }
  0x27   :  { %207 = vmatpush.msra.mxu2 %v122_v17 }
  0x28   :  { %146 = vmatpush.msra.mxu1 %v121_v18 }
  0x29   :  { %208 = vmatpush.msra.mxu2 %v121_v18 }
  0x2a   :  { %147 = vmatpush.msra.mxu1 %v120_v19 }
  0x2b   :  { %209 = vmatpush.msra.mxu2 %v120_v19 }
  0x2c   :  { %148 = vmatpush.msra.mxu1 %v119_v20 }
  0x2d   :  { %210 = vmatpush.msra.mxu2 %v119_v20 }
  0x2e   :  { %149 = vmatpush.msra.mxu1 %v118_v21 }
  0x2f   :  { %211 = vmatpush.msra.mxu2 %v118_v21 }
  0x93   :  { %v108_v23 = vpop.f32.mrf.mxu0 }
  0x94   :  { %v109_v24 = vadd.f32 %v218_v22, %v108_v23 }
  0x96   :  { %v114_v25 = vmax.f32 %v109_v24, 0.0 }
  0x98   :  { %150 = vmatmul.f32.vlgmr.msra.gmra.mxu1 %v114_v25 }
  0x9b   :  { %v111_v26 = vpop.f32.mrf.mxu0 }
  0x9c   :  { %v112_v27 = vadd.f32 %v218_v22, %v111_v26 }
  0x9e   :  { %v115_v28 = vmax.f32 %v112_v27, 0.0 }
  0xa0   :  { %153 = vmatmul.f32.vlgmr.msra.gmra.mxu2 %v115_v28 }
 0x115   :  { %v151_v30 = vpop.f32.mrf.mxu1 }
 0x116   :  { %v170_v31 = vadd.f32 %v219_v29, %v151_v30 }
 0x118   :  { %172 = vst [vmem:[#allocation9] sm:$0xff] %v170_v31 }
 0x123   :  { %v154_v32 = vpop.f32.mrf.mxu2 }
 0x124   :  { %v171_v33 = vadd.f32 %v219_v29, %v154_v32 }
 0x126   :  { %173 = vst [vmem:[#allocation9 + $0x8] sm:$0xff] %v171_v33 }
 0x127   :  { %186 = dma.vmem_to_hbm [thread:$0]  %s179_s12, 256, %s181_s2, [#allocation5], %s323_s26, %s323_s26, %s324_s27  }
 0x128   :  { %320 = dma.done.wait [#allocation5], 256  }
 0x129   :  { %321 = vsyncadd [#allocation5], 4294967040 }
 0x12a   :  { %191 = vsyncpa [#allocation4], 1 }
 0x12b   :  { %192 = vsyncpa [#allocation7], 1 }
 0x12c   :  { %193 = vsyncpa [#allocation5], 1 }

</bundles_post_ra>
